<compile_context>
chip_gen: v6e
topology: v6e:2x2x1
jax: 0.10.0
libtpu: 0.0.40
codegen_flags: <defaults>
</compile_context>

<pallas_src>
import functools

import jax
import jax.numpy as jnp
from jax.experimental import pallas as pl
from jax.experimental.pallas import tpu as pltpu

# ----- model config (small, consistent with the module) -----
BATCH = 2
SEQ = 8
HIDDEN = 64
EXPERT_NUM = 4
TOPK = 2
SHARED_EXPERT_NUM = 2

_LANE = 128  # TPU lane width


def _round_up(v, m):
    return (v + m - 1) // m * m


def _share_expert_moe_kernel(x_ref, gw_ref, gb_ref, ww_ref, wb_ref,
                             out_ref, logits_ref,
                             *, expert_num, topk, shared_num, hidden_out_p):
    x = x_ref[...]                                              # (T, Kp) f32

    # ---------------- router (f32, lane-dense 128-wide) ----------------
    logits = jnp.dot(x, gw_ref[...], preferred_element_type=jnp.float32,
                     precision=jax.lax.Precision.HIGHEST) + gb_ref[...]   # (T, 128)
    logits_ref[...] = logits                                    # lane-dense store

    # Padded lanes carry a -1e30 bias -> softmax prob exactly 0 there.
    probs = jax.nn.softmax(logits, axis=-1)                     # (T, 128) f32

    # Iterative top-k (ties resolved to the lowest index, matching torch.topk).
    iota = jax.lax.broadcasted_iota(jnp.int32, probs.shape, dimension=1)
    remaining = probs
    topk_w = jnp.zeros_like(probs)
    for _ in range(topk):
        cur_max = jnp.max(remaining, axis=-1, keepdims=True)
        sel = remaining == cur_max
        masked_iota = jnp.where(sel, iota, probs.shape[-1])
        first_idx = jnp.min(masked_iota, axis=-1, keepdims=True)
        sel_first = iota == first_idx
        topk_w = topk_w + jnp.where(sel_first, remaining, 0.0)
        remaining = jnp.where(sel_first, -jnp.inf, remaining)

    # Renormalize over the selected experts; divide goes to the EUP (approx recip).
    topk_w = topk_w * pl.reciprocal(
        jnp.sum(topk_w, axis=-1, keepdims=True), approx=True)

    # -------- one wide matmul: all sparse + shared experts at once --------
    # bf16 operands, f32 accumulation.  N = (E+S)*Hp is a multiple of 128.
    y = jnp.dot(x.astype(ww_ref.dtype), ww_ref[...],
                preferred_element_type=jnp.float32)             # (T, (E+S)*Hp) f32
    y = y + wb_ref[...]                                         # all biases, one add

    # -------- combine via 128-lane-aligned static slices --------
    acc = jnp.zeros((x.shape[0], hidden_out_p), jnp.float32)
    for e in range(expert_num):
        acc = acc + topk_w[:, e:e + 1] * y[:, e * hidden_out_p:(e + 1) * hidden_out_p]
    for s in range(shared_num):
        lo = (expert_num + s) * hidden_out_p
        acc = acc + y[:, lo:lo + hidden_out_p]

    out_ref[...] = acc.astype(out_ref.dtype)                    # lane-dense store


def share_expert_moe(x, gate_w, gate_b, expert_w, expert_b, shared_w, shared_b,
                     *, topk=TOPK, use_bf16_matmul=True, max_tile_tokens=512):
    """x: (batch, seq, hidden). Returns (out (batch, seq, hidden), logits (tokens, E))."""
    batch, seq, hidden = x.shape
    tokens = batch * seq
    expert_num = gate_w.shape[1]
    shared_num = shared_w.shape[0]
    mm_dtype = jnp.bfloat16 if use_bf16_matmul else x.dtype

    k_p = _round_up(hidden, _LANE)          # contraction dim, zero-padded
    h_p = _round_up(hidden, _LANE)          # per-expert output block, lane-aligned
    gate_lanes = _round_up(expert_num, _LANE)

    # --- lane-dense padded gate (router stays f32) ---
    gw_pad = jnp.zeros((k_p, gate_lanes), jnp.float32).at[:hidden, :expert_num].set(
        gate_w.astype(jnp.float32))
    gb_pad = jnp.full((1, gate_lanes), -1e30, jnp.float32).at[:, :expert_num].set(
        gate_b.reshape(1, expert_num).astype(jnp.float32))

    # --- one wide weight slab: [expert_0 .. expert_{E-1}, shared_0 .. shared_{S-1}],
    #     each block padded to h_p output lanes (zero pad -> numerics unchanged) ---
    def _pad_w(w3):   # (N, H, H) -> (k_p, N*h_p)
        n = w3.shape[0]
        w = jnp.transpose(w3, (1, 0, 2))                                  # (H, N, H)
        w = jnp.pad(w, ((0, k_p - hidden), (0, 0), (0, h_p - hidden)))
        return w.reshape(k_p, n * h_p)

    def _pad_b(b2):   # (N, H) -> (1, N*h_p)
        n = b2.shape[0]
        b = jnp.pad(b2, ((0, 0), (0, h_p - hidden)))
        return b.reshape(1, n * h_p)

    wide_w = jnp.concatenate([_pad_w(expert_w), _pad_w(shared_w)],
                             axis=1).astype(mm_dtype)             # (k_p, (E+S)*h_p)
    wide_b = jnp.concatenate([_pad_b(expert_b), _pad_b(shared_b)],
                             axis=1).astype(jnp.float32)          # (1, (E+S)*h_p)
    n_wide = wide_w.shape[1]

    # --- token tiling (sublane-aligned), K padded to 128 lanes ---
    tile_t = min(max_tile_tokens, _round_up(tokens, 8))
    tokens_p = _round_up(tokens, tile_t)
    x_flat = x.reshape(tokens, hidden).astype(jnp.float32)
    x_flat = jnp.pad(x_flat, ((0, tokens_p - tokens), (0, k_p - hidden)))
    grid = (tokens_p // tile_t,)

    kernel = functools.partial(
        _share_expert_moe_kernel,
        expert_num=expert_num, topk=topk, shared_num=shared_num, hidden_out_p=h_p)

    out_pad, logits_pad = pl.pallas_call(
        kernel,
        grid=grid,
        in_specs=[
            pl.BlockSpec((tile_t, k_p),      lambda i: (i, 0)),   # x token tile
            pl.BlockSpec((k_p, gate_lanes),  lambda i: (0, 0)),   # gate W (VMEM-resident)
            pl.BlockSpec((1, gate_lanes),    lambda i: (0, 0)),   # gate b (VMEM-resident)
            pl.BlockSpec((k_p, n_wide),      lambda i: (0, 0)),   # wide expert slab
            pl.BlockSpec((1, n_wide),        lambda i: (0, 0)),   # wide bias row
        ],
        out_specs=(
            pl.BlockSpec((tile_t, h_p),        lambda i: (i, 0)), # lane-dense output tile
            pl.BlockSpec((tile_t, gate_lanes), lambda i: (i, 0)), # lane-dense logits
        ),
        out_shape=(
            jax.ShapeDtypeStruct((tokens_p, h_p), x.dtype),
            jax.ShapeDtypeStruct((tokens_p, gate_lanes), jnp.float32),
        ),
        compiler_params=pltpu.CompilerParams(
            dimension_semantics=("parallel",),
            vmem_limit_bytes=64 * 1024 * 1024),
    )(x_flat, gw_pad, gb_pad, wide_w, wide_b)

    out = out_pad[:tokens, :hidden].reshape(batch, seq, hidden)
    logits = logits_pad[:tokens, :expert_num]
    return out, logits


# ---------------- pure-JAX reference (for verification) ----------------
def _reference(x, gate_w, gate_b, expert_w, expert_b, shared_w, shared_b,
               *, topk=TOPK, use_bf16_matmul=True):
    b, s, h = x.shape
    e_num = gate_w.shape[1]
    s_num = shared_w.shape[0]
    mm_dtype = jnp.bfloat16 if use_bf16_matmul else x.dtype

    hs = x.reshape(-1, h)
    logits = jnp.dot(hs, gate_w, precision=jax.lax.Precision.HIGHEST) \
        + gate_b.reshape(1, -1)
    probs = jax.nn.softmax(logits.astype(jnp.float32), axis=-1)
    w, idx = jax.lax.top_k(probs, topk)
    w = w / jnp.sum(w, axis=-1, keepdims=True)

    hs_mm = hs.astype(mm_dtype)
    out = jnp.zeros((hs.shape[0], h), jnp.float32)
    for e in range(e_num):
        ye = jnp.dot(hs_mm, expert_w[e].astype(mm_dtype),
                     preferred_element_type=jnp.float32) + expert_b[e]
        we = jnp.sum(jnp.where(idx == e, w, 0.0), axis=-1, keepdims=True)
        out = out + we * ye
    for k in range(s_num):
        out = out + jnp.dot(hs_mm, shared_w[k].astype(mm_dtype),
                            preferred_element_type=jnp.float32) + shared_b[k]
    return out.reshape(b, s, h).astype(x.dtype), logits


if __name__ == "__main__":
    key = jax.random.PRNGKey(0)
    ks = jax.random.split(key, 8)
    scale = 1.0 / (HIDDEN ** 0.5)

    x = jax.random.normal(ks[0], (BATCH, SEQ, HIDDEN), jnp.float32)
    gate_w = jax.random.normal(ks[1], (HIDDEN, EXPERT_NUM), jnp.float32) * scale
    gate_b = jax.random.normal(ks[2], (1, EXPERT_NUM), jnp.float32) * scale
    expert_w = jax.random.normal(ks[3], (EXPERT_NUM, HIDDEN, HIDDEN), jnp.float32) * scale
    expert_b = jax.random.normal(ks[4], (EXPERT_NUM, HIDDEN), jnp.float32) * scale
    shared_w = jax.random.normal(ks[5], (SHARED_EXPERT_NUM, HIDDEN, HIDDEN), jnp.float32) * scale
    shared_b = jax.random.normal(ks[6], (SHARED_EXPERT_NUM, HIDDEN), jnp.float32) * scale

    out, logits = jax.jit(share_expert_moe)(
        x, gate_w, gate_b, expert_w, expert_b, shared_w, shared_b)
    jax.block_until_ready((out, logits))

    ref_out, ref_logits = _reference(
        x, gate_w, gate_b, expert_w, expert_b, shared_w, shared_b)

    assert out.shape == (BATCH, SEQ, HIDDEN)
    assert logits.shape == (BATCH * SEQ, EXPERT_NUM)
    assert jnp.allclose(logits, ref_logits, atol=1e-4, rtol=1e-4), "logits mismatch"
    # Output tolerance covers bf16 MXU operands + approx-reciprocal renorm.
    assert jnp.allclose(out, ref_out, atol=5e-3, rtol=5e-3), "output mismatch"

    print("KERNEL_OK")
</pallas_src>

<mosaic_0001>
module attributes {stable_mosaic.version = 11 : i64} {
  func.func @_share_expert_moe_kernel(%arg0: i32, %arg1: memref<16x128xf32, #tpu.memory_space<vmem>>, %arg2: memref<128x128xf32, #tpu.memory_space<vmem>>, %arg3: memref<1x128xf32, #tpu.memory_space<vmem>>, %arg4: memref<128x768xbf16, #tpu.memory_space<vmem>>, %arg5: memref<1x768xf32, #tpu.memory_space<vmem>>, %arg6: memref<16x128xf32, #tpu.memory_space<vmem>>, %arg7: memref<16x128xf32, #tpu.memory_space<vmem>>) attributes {dimension_semantics = [#tpu.dimension_semantics<parallel>], iteration_bounds = array<i64: 1>, scalar_prefetch = 0 : i64, scratch_operands = 0 : i64, tpu.core_type = #tpu.core_type<tc>, window_params = [{transform_indices = @transform_0, window_bounds = array<i64: 16, 128>}, {pipeline_mode = #tpu.pipeline_mode<synchronous>, transform_indices = @transform_1, window_bounds = array<i64: 128, 128>}, {pipeline_mode = #tpu.pipeline_mode<synchronous>, transform_indices = @transform_2, window_bounds = array<i64: 1, 128>}, {pipeline_mode = #tpu.pipeline_mode<synchronous>, transform_indices = @transform_3, window_bounds = array<i64: 128, 768>}, {pipeline_mode = #tpu.pipeline_mode<synchronous>, transform_indices = @transform_4, window_bounds = array<i64: 1, 768>}, {transform_indices = @transform_5, window_bounds = array<i64: 16, 128>}, {transform_indices = @transform_6, window_bounds = array<i64: 16, 128>}]} {
    %c0 = arith.constant 0 : index
    %c0_0 = arith.constant 0 : index
    %0 = vector.load %arg1[%c0, %c0_0] : memref<16x128xf32, #tpu.memory_space<vmem>>, vector<16x128xf32>
    %c0_1 = arith.constant 0 : index
    %c0_2 = arith.constant 0 : index
    %1 = vector.load %arg2[%c0_1, %c0_2] : memref<128x128xf32, #tpu.memory_space<vmem>>, vector<128x128xf32>
    %cst = arith.constant dense<0.000000e+00> : vector<16x128xf32>
    %2 = tpu.matmul %0, %1, %cst {dimension_numbers = #tpu.dot_dimension_numbers<[1], [0], [0], [1], [0, 0, 1, 1], [], []>, precision = #tpu.contract_precision<fp32>} : vector<16x128xf32>, vector<128x128xf32>, vector<16x128xf32> -> vector<16x128xf32>
    %c0_3 = arith.constant 0 : index
    %c0_4 = arith.constant 0 : index
    %3 = vector.load %arg3[%c0_3, %c0_4] : memref<1x128xf32, #tpu.memory_space<vmem>>, vector<1x128xf32>
    %4 = vector.broadcast %3 : vector<1x128xf32> to vector<16x128xf32>
    %5 = arith.addf %2, %4 : vector<16x128xf32>
    %c0_5 = arith.constant 0 : index
    %c0_6 = arith.constant 0 : index
    %6 = vector.load %arg7[%c0_5, %c0_6] : memref<16x128xf32, #tpu.memory_space<vmem>>, vector<16x128xf32>
    tpu.vector_store %arg7[%c0_5, %c0_6], %5 {strides = array<i32>} : memref<16x128xf32, #tpu.memory_space<vmem>>, vector<16x128xf32>,
    %cst_7 = arith.constant dense<0xFF800000> : vector<16xf32>
    %7 = vector.multi_reduction <maximumf>, %5, %cst_7 [1] : vector<16x128xf32> to vector<16xf32>
    %cst_8 = arith.constant 0xFF800000 : f32
    %8 = vector.broadcast %cst_8 : f32 to vector<16xf32>
    %9 = arith.maximumf %8, %7 : vector<16xf32>
    %10 = vector.shape_cast %9 : vector<16xf32> to vector<16x1xf32>
    %11 = vector.broadcast %10 : vector<16x1xf32> to vector<16x128xf32>
    %12 = arith.subf %5, %11 : vector<16x128xf32>
    %13 = math.exp %12 : vector<16x128xf32>
    %cst_9 = arith.constant dense<0.000000e+00> : vector<16xf32>
    %14 = vector.multi_reduction <add>, %13, %cst_9 [1] : vector<16x128xf32> to vector<16xf32>
    %15 = vector.shape_cast %14 : vector<16xf32> to vector<16x1xf32>
    %16 = vector.broadcast %15 : vector<16x1xf32> to vector<16x128xf32>
    %17 = arith.divf %13, %16 : vector<16x128xf32>
    %18 = tpu.iota {dimensions = array<i32: 1>} : vector<16x128xi32>
    %cst_10 = arith.constant 0.000000e+00 : f32
    %19 = vector.broadcast %cst_10 : f32 to vector<16x128xf32>
    %cst_11 = arith.constant dense<0xFF800000> : vector<16xf32>
    %20 = vector.multi_reduction <maximumf>, %17, %cst_11 [1] : vector<16x128xf32> to vector<16xf32>
    %21 = vector.shape_cast %20 : vector<16xf32> to vector<16x1xf32>
    %22 = vector.broadcast %21 : vector<16x1xf32> to vector<16x128xf32>
    %23 = arith.cmpf oeq, %17, %22 : vector<16x128xf32>
    %c128_i32 = arith.constant 128 : i32
    %24 = vector.broadcast %c128_i32 : i32 to vector<16x128xi32>
    %25 = arith.select %23, %18, %24 : vector<16x128xi1>, vector<16x128xi32>
    %cst_12 = arith.constant dense<2147483647> : vector<16xi32>
    %26 = vector.multi_reduction <minsi>, %25, %cst_12 [1] : vector<16x128xi32> to vector<16xi32>
    %27 = vector.shape_cast %26 : vector<16xi32> to vector<16x1xi32>
    %28 = vector.broadcast %27 : vector<16x1xi32> to vector<16x128xi32>
    %29 = arith.cmpi eq, %18, %28 : vector<16x128xi32>
    %cst_13 = arith.constant 0.000000e+00 : f32
    %30 = vector.broadcast %cst_13 : f32 to vector<16x128xf32>
    %31 = arith.select %29, %17, %30 : vector<16x128xi1>, vector<16x128xf32>
    %32 = arith.addf %19, %31 : vector<16x128xf32>
    %cst_14 = arith.constant 0xFF800000 : f32
    %33 = vector.broadcast %cst_14 : f32 to vector<16x128xf32>
    %34 = arith.select %29, %33, %17 : vector<16x128xi1>, vector<16x128xf32>
    %cst_15 = arith.constant dense<0xFF800000> : vector<16xf32>
    %35 = vector.multi_reduction <maximumf>, %34, %cst_15 [1] : vector<16x128xf32> to vector<16xf32>
    %36 = vector.shape_cast %35 : vector<16xf32> to vector<16x1xf32>
    %37 = vector.broadcast %36 : vector<16x1xf32> to vector<16x128xf32>
    %38 = arith.cmpf oeq, %34, %37 : vector<16x128xf32>
    %c128_i32_16 = arith.constant 128 : i32
    %39 = vector.broadcast %c128_i32_16 : i32 to vector<16x128xi32>
    %40 = arith.select %38, %18, %39 : vector<16x128xi1>, vector<16x128xi32>
    %cst_17 = arith.constant dense<2147483647> : vector<16xi32>
    %41 = vector.multi_reduction <minsi>, %40, %cst_17 [1] : vector<16x128xi32> to vector<16xi32>
    %42 = vector.shape_cast %41 : vector<16xi32> to vector<16x1xi32>
    %43 = vector.broadcast %42 : vector<16x1xi32> to vector<16x128xi32>
    %44 = arith.cmpi eq, %18, %43 : vector<16x128xi32>
    %cst_18 = arith.constant 0.000000e+00 : f32
    %45 = vector.broadcast %cst_18 : f32 to vector<16x128xf32>
    %46 = arith.select %44, %34, %45 : vector<16x128xi1>, vector<16x128xf32>
    %47 = arith.addf %32, %46 : vector<16x128xf32>
    %cst_19 = arith.constant dense<0.000000e+00> : vector<16xf32>
    %48 = vector.multi_reduction <add>, %47, %cst_19 [1] : vector<16x128xf32> to vector<16xf32>
    %49 = vector.shape_cast %48 : vector<16xf32> to vector<16x1xf32>
    %50 = tpu.reciprocal %49 {approx = true} : vector<16x1xf32> -> vector<16x1xf32>
    %51 = vector.broadcast %50 : vector<16x1xf32> to vector<16x128xf32>
    %52 = arith.mulf %47, %51 : vector<16x128xf32>
    %53 = arith.truncf %0 : vector<16x128xf32> to vector<16x128xbf16>
    %c0_20 = arith.constant 0 : index
    %c0_21 = arith.constant 0 : index
    %54 = vector.load %arg4[%c0_20, %c0_21] : memref<128x768xbf16, #tpu.memory_space<vmem>>, vector<128x768xbf16>
    %cst_22 = arith.constant dense<0.000000e+00> : vector<16x768xf32>
    %55 = tpu.matmul %53, %54, %cst_22 {dimension_numbers = #tpu.dot_dimension_numbers<[1], [0], [0], [1], [0, 0, 1, 1], [], []>} : vector<16x128xbf16>, vector<128x768xbf16>, vector<16x768xf32> -> vector<16x768xf32>
    %c0_23 = arith.constant 0 : index
    %c0_24 = arith.constant 0 : index
    %56 = vector.load %arg5[%c0_23, %c0_24] : memref<1x768xf32, #tpu.memory_space<vmem>>, vector<1x768xf32>
    %57 = vector.broadcast %56 : vector<1x768xf32> to vector<16x768xf32>
    %58 = arith.addf %55, %57 : vector<16x768xf32>
    %cst_25 = arith.constant 0.000000e+00 : f32
    %59 = vector.broadcast %cst_25 : f32 to vector<16x128xf32>
    %60 = vector.extract_strided_slice %52 {offsets = [0, 0], sizes = [16, 1], strides = [1, 1]} : vector<16x128xf32> to vector<16x1xf32>
    %61 = vector.extract_strided_slice %58 {offsets = [0, 0], sizes = [16, 128], strides = [1, 1]} : vector<16x768xf32> to vector<16x128xf32>
    %62 = vector.broadcast %60 : vector<16x1xf32> to vector<16x128xf32>
    %63 = arith.mulf %62, %61 : vector<16x128xf32>
    %64 = arith.addf %59, %63 : vector<16x128xf32>
    %65 = vector.extract_strided_slice %52 {offsets = [0, 1], sizes = [16, 1], strides = [1, 1]} : vector<16x128xf32> to vector<16x1xf32>
    %66 = vector.extract_strided_slice %58 {offsets = [0, 128], sizes = [16, 128], strides = [1, 1]} : vector<16x768xf32> to vector<16x128xf32>
    %67 = vector.broadcast %65 : vector<16x1xf32> to vector<16x128xf32>
    %68 = arith.mulf %67, %66 : vector<16x128xf32>
    %69 = arith.addf %64, %68 : vector<16x128xf32>
    %70 = vector.extract_strided_slice %52 {offsets = [0, 2], sizes = [16, 1], strides = [1, 1]} : vector<16x128xf32> to vector<16x1xf32>
    %71 = vector.extract_strided_slice %58 {offsets = [0, 256], sizes = [16, 128], strides = [1, 1]} : vector<16x768xf32> to vector<16x128xf32>
    %72 = vector.broadcast %70 : vector<16x1xf32> to vector<16x128xf32>
    %73 = arith.mulf %72, %71 : vector<16x128xf32>
    %74 = arith.addf %69, %73 : vector<16x128xf32>
    %75 = vector.extract_strided_slice %52 {offsets = [0, 3], sizes = [16, 1], strides = [1, 1]} : vector<16x128xf32> to vector<16x1xf32>
    %76 = vector.extract_strided_slice %58 {offsets = [0, 384], sizes = [16, 128], strides = [1, 1]} : vector<16x768xf32> to vector<16x128xf32>
    %77 = vector.broadcast %75 : vector<16x1xf32> to vector<16x128xf32>
    %78 = arith.mulf %77, %76 : vector<16x128xf32>
    %79 = arith.addf %74, %78 : vector<16x128xf32>
    %80 = vector.extract_strided_slice %58 {offsets = [0, 512], sizes = [16, 128], strides = [1, 1]} : vector<16x768xf32> to vector<16x128xf32>
    %81 = arith.addf %79, %80 : vector<16x128xf32>
    %82 = vector.extract_strided_slice %58 {offsets = [0, 640], sizes = [16, 128], strides = [1, 1]} : vector<16x768xf32> to vector<16x128xf32>
    %83 = arith.addf %81, %82 : vector<16x128xf32>
    %c0_26 = arith.constant 0 : index
    %c0_27 = arith.constant 0 : index
    %84 = vector.load %arg6[%c0_26, %c0_27] : memref<16x128xf32, #tpu.memory_space<vmem>>, vector<16x128xf32>
    tpu.vector_store %arg6[%c0_26, %c0_27], %83 {strides = array<i32>} : memref<16x128xf32, #tpu.memory_space<vmem>>, vector<16x128xf32>,
    return
  }
  func.func @transform_0(%arg0: i32) -> (i32, i32) {
    %c0_i32 = arith.constant 0 : i32
    %c0_i32_0 = arith.constant 0 : i32
    return %arg0, %c0_i32 : i32, i32
  }
  func.func @transform_1(%arg0: i32) -> (i32, i32) {
    %c0_i32 = arith.constant 0 : i32
    %c0_i32_0 = arith.constant 0 : i32
    %c0_i32_1 = arith.constant 0 : i32
    return %c0_i32, %c0_i32_0 : i32, i32
  }
  func.func @transform_2(%arg0: i32) -> (i32, i32) {
    %c0_i32 = arith.constant 0 : i32
    %c0_i32_0 = arith.constant 0 : i32
    %c0_i32_1 = arith.constant 0 : i32
    return %c0_i32, %c0_i32_0 : i32, i32
  }
  func.func @transform_3(%arg0: i32) -> (i32, i32) {
    %c0_i32 = arith.constant 0 : i32
    %c0_i32_0 = arith.constant 0 : i32
    %c0_i32_1 = arith.constant 0 : i32
    return %c0_i32, %c0_i32_0 : i32, i32
  }
  func.func @transform_4(%arg0: i32) -> (i32, i32) {
    %c0_i32 = arith.constant 0 : i32
    %c0_i32_0 = arith.constant 0 : i32
    %c0_i32_1 = arith.constant 0 : i32
    return %c0_i32, %c0_i32_0 : i32, i32
  }
  func.func @transform_5(%arg0: i32) -> (i32, i32) {
    %c0_i32 = arith.constant 0 : i32
    %c0_i32_0 = arith.constant 0 : i32
    return %arg0, %c0_i32 : i32, i32
  }
  func.func @transform_6(%arg0: i32) -> (i32, i32) {
    %c0_i32 = arith.constant 0 : i32
    %c0_i32_0 = arith.constant 0 : i32
    return %arg0, %c0_i32 : i32, i32
  }
}

</mosaic_0001>

<bundles_post_ra>
// kernel: share_expert_moe.1
= control target key start
LH: loop header
LB: loop body
LE: loop exit
PB: predicated region body
PF: predicated region fallthrough
CT: control target
= control target key end

     0   :  { %s2505_s1 = inlined_call_operand.vmem [shape: f32[128,128], index: 1, kind: input, shape index: {}]   ;;  %s2506_s0 = inlined_call_operand.vmem [shape: f32[16,128], index: 0, kind: input, shape index: {}]   ;;  %s2507_s2 = inlined_call_operand.vmem [shape: f32[1,128], index: 2, kind: input, shape index: {}]   ;;  %s2508_s6 = inlined_call_operand.vmem [shape: f32[16,128], index: 6, kind: output, shape index: {1}]   ;;  %s2509_s3 = inlined_call_operand.vmem [shape: bf16[128,768], index: 3, kind: input, shape index: {}]   ;;  %s2510_s4 = inlined_call_operand.vmem [shape: f32[1,768], index: 4, kind: input, shape index: {}]   ;;  %s2511_s5 = inlined_call_operand.vmem [shape: f32[16,128], index: 5, kind: output, shape index: {0}]  }
   0x1   :  { %v40_v0 = vld [vmem:[%s2505_s1 + $0x78] sm:$0xff]  ;;  %v39_v1 = vld [vmem:[%s2505_s1 + $0x70] sm:$0xff]  ;;  %v38_v2 = vld [vmem:[%s2505_s1 + $0x68] sm:$0xff] }
   0x2   :  { %v1873_v3 = vand.u32 4294901760, %v40_v0  ;;  %v1875_v4 = vand.u32 4294901760, %v39_v1  ;;  %v1877_v5 = vand.u32 4294901760, %v38_v2  ;;  %v37_v6 = vld [vmem:[%s2505_s1 + $0x60] sm:$0xff]  ;;  %v36_v7 = vld [vmem:[%s2505_s1 + $0x58] sm:$0xff]  ;;  %v35_v8 = vld [vmem:[%s2505_s1 + $0x50] sm:$0xff] }
   0x3   :  { %v1888_v9 = vand.u32 4294901760, %v37_v6  ;;  %v1890_v10 = vand.u32 4294901760, %v36_v7  ;;  %v1892_v11 = vand.u32 4294901760, %v35_v8  ;;  %v34_v12 = vld [vmem:[%s2505_s1 + $0x48] sm:$0xff]  ;;  %v33_v13 = vld [vmem:[%s2505_s1 + $0x40] sm:$0xff]  ;;  %v32_v18 = vld [vmem:[%s2505_s1 + $0x38] sm:$0xff] }
   0x4   :  { %1519 = vmatprep.subr.mxu0 %v1873_v3  ;;  %v1902_v14 = vsub.f32 %v40_v0, %v1873_v3  ;;  %v1905_v15 = vsub.f32 %v39_v1, %v1875_v4  ;;  %v1907_v16 = vand.u32 4294901760, %v34_v12  ;;  %v1910_v17 = vsub.f32 %v38_v2, %v1877_v5  ;;  %v31_v25 = vld [vmem:[%s2505_s1 + $0x30] sm:$0xff]  ;;  %v30_v35 = vld [vmem:[%s2505_s1 + $0x28] sm:$0xff]  ;;  %v29_v40 = vld [vmem:[%s2505_s1 + $0x20] sm:$0xff] }
   0x5   :  { %1520 = vmatpush3.msra.mxu0 %v1873_v3  ;;  %v1917_v19 = vsub.f32 %v37_v6, %v1888_v9  ;;  %v1920_v20 = vsub.f32 %v36_v7, %v1890_v10  ;;  %v1932_v24 = vand.u32 4294901760, %v33_v13  ;;  %v1941_v27 = vand.u32 4294901760, %v32_v18  ;;  %v28_v48 = vld [vmem:[%s2505_s1 + $0x18] sm:$0xff]  ;;  %v1998_v49 = vld [vmem:[%s2506_s0] sm:$0xff]  ;;  %v2012_v54 = vld [vmem:[%s2506_s0 + $0x8] sm:$0xff] }
   0x6   :  { %1521 = vmatprep.subr.mxu0 %v1875_v4  ;;  %v1924_v21 = vand.u32 4294901760, %v1902_v14  ;;  %v1927_v22 = vand.u32 4294901760, %v1905_v15  ;;  %v1930_v23 = vand.u32 4294901760, %v1910_v17  ;;  %v1947_v29 = vsub.f32 %v35_v8, %v1892_v11  ;;  %2516 = vst [vmem:[#allocation2_spill] sm:$0xff] %v1998_v49  ;;  %2517 = vst [vmem:[#allocation3_spill] sm:$0xff] %v2012_v54  ;;  %v27_v59 = vld [vmem:[%s2505_s1 + $0x10] sm:$0xff] }
   0x7   :  { %1522 = vmatpush3.msra.mxu0 %v1875_v4  ;;  %v1939_v26 = vand.u32 4294901760, %v1917_v19  ;;  %v1944_v28 = vand.u32 4294901760, %v1920_v20  ;;  %v1957_v33 = vsub.f32 %v34_v12, %v1907_v16  ;;  %v1960_v34 = vand.u32 4294901760, %v31_v25  ;;  %v26_v2 = vld [vmem:[%s2505_s1 + $0x8] sm:$0xff] }
   0x8   :  { %1523 = vmatprep.subr.mxu0 %v1877_v5  ;;  %v153_v30 = vsub.f32 %v1902_v14, %v1924_v21  ;;  %v160_v31 = vsub.f32 %v1905_v15, %v1927_v22  ;;  %v167_v32 = vsub.f32 %v1910_v17, %v1930_v23  ;;  %v1969_v39 = vand.u32 4294901760, %v1947_v29 }
   0x9   :  { %1524 = vmatpush3.msra.mxu0 %v1877_v5  ;;  %v174_v38 = vsub.f32 %v1917_v19, %v1939_v26  ;;  %v181_v41 = vsub.f32 %v1920_v20, %v1944_v28  ;;  %v1978_v42 = vand.u32 4294901760, %v1957_v33  ;;  %v1981_v43 = vsub.f32 %v33_v13, %v1932_v24 }
   0xa   :  { %1525 = vmatprep.subr.mxu0 %v1888_v9  ;;  %v154_v36 = vand.u32 4294901760, %v153_v30  ;;  %v161_v37 = vand.u32 4294901760, %v160_v31  ;;  %v168_v44 = vand.u32 4294901760, %v167_v32  ;;  %v1984_v45 = vand.u32 4294901760, %v30_v35 }
   0xb   :  { %1526 = vmatpush3.msra.mxu0 %v1888_v9  ;;  %v1987_v46 = vsub.f32 %v32_v18, %v1941_v27  ;;  %v1990_v47 = vand.u32 4294901760, %v29_v40  ;;  %v175_v50 = vand.u32 4294901760, %v174_v38  ;;  %v188_v51 = vsub.f32 %v1947_v29, %v1969_v39  ;;  %v25_v18 = vld [vmem:[%s2505_s1] sm:$0xff] }
   0xc   :  { %1527 = vmatprep.subr.mxu0 %v1890_v10  ;;  %1554 = vmatprep.subr.mxu1 %v154_v36  ;;  %v2004_v52 = vand.u32 4294901760, %v1981_v43  ;;  %v2007_v53 = vsub.f32 %v31_v25, %v1960_v34  ;;  %v182_v55 = vand.u32 4294901760, %v181_v41  ;;  %v195_v56 = vsub.f32 %v1957_v33, %v1978_v42 }
   0xd   :  { %1528 = vmatpush3.msra.mxu0 %v1890_v10  ;;  %1555 = vmatpush3.msra.mxu1 %v154_v36  ;;  %v2018_v57 = vand.u32 4294901760, %v28_v48  ;;  %v2021_v58 = vand.u32 4294901760, %v1987_v46  ;;  %v2027_v60 = vsub.f32 %v30_v35, %v1984_v45  ;;  %v2030_v61 = vand.u32 4294901760, %v1998_v49 }
   0xe   :  { %1529 = vmatprep.subr.mxu0 %v1892_v11  ;;  %1556 = vmatprep.subr.mxu1 %v161_v37  ;;  %v2034_v62 = vand.u32 4294901760, %v2012_v54  ;;  %v189_v63 = vand.u32 4294901760, %v188_v51  ;;  %v202_v0 = vsub.f32 %v1981_v43, %v2004_v52  ;;  %v2040_v1 = vand.u32 4294901760, %v2007_v53 }
   0xf   :  { %1530 = vmatpush3.msra.mxu0 %v1892_v11  ;;  %1557 = vmatpush3.msra.mxu1 %v161_v37  ;;  %v2046_v6 = vsub.f32 %v29_v40, %v1990_v47  ;;  %v196_v7 = vand.u32 4294901760, %v195_v56  ;;  %v2049_v8 = vand.u32 4294901760, %v27_v59  ;;  %v209_v12 = vsub.f32 %v1987_v46, %v2021_v58 }
  0x10   :  { %1531 = vmatprep.subr.mxu0 %v1907_v16  ;;  %1558 = vmatprep.subr.mxu1 %v168_v44  ;;  %v2055_v13 = vand.u32 4294901760, %v2027_v60  ;;  %v2062_v25 = vsub.f32 %v1998_v49, %v2030_v61  ;;  %v2065_v30 = vsub.f32 %v28_v48, %v2018_v57  ;;  %v2068_v31 = vand.u32 4294901760, %v26_v2 }
  0x11   :  { %1532 = vmatpush3.msra.mxu0 %v1907_v16  ;;  %1559 = vmatpush3.msra.mxu1 %v168_v44  ;;  %v2072_v32 = vsub.f32 %v2012_v54, %v2034_v62  ;;  %v203_v35 = vand.u32 4294901760, %v202_v0  ;;  %v216_v36 = vsub.f32 %v2007_v53, %v2040_v1  ;;  %v2078_v37 = vand.u32 4294901760, %v2046_v6 }
  0x12   :  { %1533 = vmatprep.subr.mxu0 %v1932_v24  ;;  %1560 = vmatprep.subr.mxu1 %v175_v50  ;;  %v2081_v38 = vand.u32 4294901760, %v25_v18  ;;  %v2084_v40 = vsub.f32 %v27_v59, %v2049_v8  ;;  %v210_v41 = vand.u32 4294901760, %v209_v12  ;;  %v223_v44 = vsub.f32 %v2027_v60, %v2055_v13 }
  0x13   :  { %1534 = vmatpush3.msra.mxu0 %v1932_v24  ;;  %1561 = vmatpush3.msra.mxu1 %v175_v50  ;;  %v2512_v48 = vand.u32 4294901760, %v2062_v25  ;;  %v2091_v50 = vand.u32 4294901760, %v2065_v30  ;;  %v2513_v51 = vand.u32 4294901760, %v2072_v32  ;;  %v217_v56 = vand.u32 4294901760, %v216_v36 }
  0x14   :  { %1535 = vmatprep.subr.mxu0 %v1941_v27  ;;  %1562 = vmatprep.subr.mxu1 %v182_v55  ;;  %v230_v59 = vsub.f32 %v2046_v6, %v2078_v37  ;;  %v2106_v0 = vsub.f32 %v25_v18, %v2081_v38 }
  0x15   :  { %1536 = vmatpush3.msra.mxu0 %v1941_v27  ;;  %1563 = vmatpush3.msra.mxu1 %v182_v55  ;;  %v2096_v55 = vsub.f32 %v26_v2, %v2068_v31  ;;  %v224_v2 = vand.u32 4294901760, %v223_v44  ;;  %v237_v12 = vsub.f32 %v2065_v30, %v2091_v50 }
  0x16   :  { %1537 = vmatprep.subr.mxu0 %v1960_v34  ;;  %1564 = vmatprep.subr.mxu1 %v189_v63  ;;  %v231_v36 = vand.u32 4294901760, %v230_v59 }
  0x17   :  { %1538 = vmatpush3.msra.mxu0 %v1960_v34  ;;  %1565 = vmatpush3.msra.mxu1 %v189_v63  ;;  %v2103_v63 = vand.u32 4294901760, %v2084_v40  ;;  %v2119_v18 = vand.u32 4294901760, %v2096_v55 }
  0x18   :  { %1539 = vmatprep.subr.mxu0 %v1984_v45  ;;  %1566 = vmatprep.subr.mxu1 %v196_v7 }
  0x19   :  { %1540 = vmatpush3.msra.mxu0 %v1984_v45  ;;  %1567 = vmatpush3.msra.mxu1 %v196_v7  ;;  %v132_v7 = vsub.f32 %v2062_v25, %v2512_v48  ;;  %v244_v44 = vsub.f32 %v2084_v40, %v2103_v63  ;;  %v2126_v48 = vand.u32 4294901760, %v2106_v0  ;;  %v251_v59 = vsub.f32 %v2096_v55, %v2119_v18 }
  0x1a   :  { %1541 = vmatprep.subr.mxu0 %v1990_v47  ;;  %1568 = vmatprep.subr.mxu1 %v203_v35 }
  0x1b   :  { %1542 = vmatpush3.msra.mxu0 %v1990_v47  ;;  %1569 = vmatpush3.msra.mxu1 %v203_v35  ;;  %v142_v35 = vsub.f32 %v2072_v32, %v2513_v51  ;;  %v238_v51 = vand.u32 4294901760, %v237_v12  ;;  %v258_v49 = vsub.f32 %v2106_v0, %v2126_v48 }
  0x1c   :  { %1543 = vmatprep.subr.mxu0 %v2018_v57  ;;  %1570 = vmatprep.subr.mxu1 %v210_v41 }
  0x1d   :  { %1544 = vmatpush3.msra.mxu0 %v2018_v57  ;;  %1571 = vmatpush3.msra.mxu1 %v210_v41  ;;  %v133_v41 = vand.u32 4294901760, %v132_v7  ;;  %v143_v54 = vand.u32 4294901760, %v142_v35  ;;  %v259_v7 = vand.u32 4294901760, %v258_v49 }
  0x1e   :  { %1545 = vmatprep.subr.mxu0 %v2049_v8  ;;  %1572 = vmatprep.subr.mxu1 %v217_v56 }
  0x1f   :  { %1546 = vmatpush3.msra.mxu0 %v2049_v8  ;;  %1573 = vmatpush3.msra.mxu1 %v217_v56  ;;  %v245_v56 = vand.u32 4294901760, %v244_v44 }
  0x20   :  { %1547 = vmatprep.subr.mxu0 %v2068_v31  ;;  %1574 = vmatprep.subr.mxu1 %v224_v2 }
  0x21   :  { %1548 = vmatpush3.msra.mxu0 %v2068_v31  ;;  %1575 = vmatpush3.msra.mxu1 %v224_v2  ;;  %v252_v2 = vand.u32 4294901760, %v251_v59 }
  0x22   :  { %1549 = vmatprep.subr.mxu0 %v2081_v38  ;;  %1576 = vmatprep.subr.mxu1 %v231_v36 }
  0x23   :  { %1550 = vmatpush3.msra.mxu0 %v2081_v38  ;;  %1577 = vmatpush3.msra.mxu1 %v231_v36 }
  0x24   :  { %1551 = vmatprep.mubr.f32.mxu0 %v133_v41  ;;  %1578 = vmatprep.subr.mxu1 %v238_v51 }
  0x25   :  { %1589 = vmatprep.subr.mxu0 %v1902_v14  ;;  %1552 = vmatmul.mubr.f32.vlgmr.msra.gmra.mxu0 %v143_v54 }
  0x26   :  { %1579 = vmatpush3.msra.mxu1 %v238_v51  ;;  %1590 = vmatpush3.msra.mxu0 %v1902_v14  ;;  %v2518_v14 = vand.u32 4294901760, %v2062_v25 }
  0x27   :  { %1580 = vmatprep.subr.mxu1 %v245_v56  ;;  %1591 = vmatprep.subr.mxu0 %v1905_v15 }
  0x28   :  { %1581 = vmatpush3.msra.mxu1 %v245_v56  ;;  %1592 = vmatpush3.msra.mxu0 %v1905_v15  ;;  %v2519_v15 = vand.u32 4294901760, %v2072_v32 }
  0x29   :  { %1582 = vmatprep.subr.mxu1 %v252_v2  ;;  %1593 = vmatprep.subr.mxu0 %v1910_v17 }
  0x2a   :  { %1583 = vmatpush3.msra.mxu1 %v252_v2  ;;  %1594 = vmatpush3.msra.mxu0 %v1910_v17 }
  0x2b   :  { %1584 = vmatprep.subr.mxu1 %v259_v7  ;;  %1595 = vmatprep.subr.mxu0 %v1917_v19 }
  0x2c   :  { %1585 = vmatpush3.msra.mxu1 %v259_v7  ;;  %1586 = vmatprep.mubr.f32.mxu1 %v2030_v61 }
  0x2d   :  { %1596 = vmatpush3.msra.mxu0 %v1917_v19  ;;  %1587 = vmatmul.mubr.f32.vlgmr.msra.gmra.mxu1 %v2034_v62 }
  0x2e   :  { %1597 = vmatprep.subr.mxu0 %v1920_v20  ;;  %1624 = vmatprep.subr.mxu1 %v1873_v3 }
  0x2f   :  { %1598 = vmatpush3.msra.mxu0 %v1920_v20  ;;  %1625 = vmatpush3.msra.mxu1 %v1873_v3 }
  0x30   :  { %1599 = vmatprep.subr.mxu0 %v1947_v29  ;;  %1626 = vmatprep.subr.mxu1 %v1875_v4 }
  0x31   :  { %1600 = vmatpush3.msra.mxu0 %v1947_v29  ;;  %1627 = vmatpush3.msra.mxu1 %v1875_v4 }
  0x32   :  { %1601 = vmatprep.subr.mxu0 %v1957_v33  ;;  %1628 = vmatprep.subr.mxu1 %v1877_v5 }
  0x33   :  { %1602 = vmatpush3.msra.mxu0 %v1957_v33  ;;  %1629 = vmatpush3.msra.mxu1 %v1877_v5 }
  0x34   :  { %1603 = vmatprep.subr.mxu0 %v1981_v43  ;;  %1630 = vmatprep.subr.mxu1 %v1888_v9 }
  0x35   :  { %1604 = vmatpush3.msra.mxu0 %v1981_v43  ;;  %1631 = vmatpush3.msra.mxu1 %v1888_v9 }
  0x36   :  { %1605 = vmatprep.subr.mxu0 %v1987_v46  ;;  %1632 = vmatprep.subr.mxu1 %v1890_v10 }
  0x37   :  { %1606 = vmatpush3.msra.mxu0 %v1987_v46  ;;  %1633 = vmatpush3.msra.mxu1 %v1890_v10 }
  0x38   :  { %1607 = vmatprep.subr.mxu0 %v2007_v53  ;;  %1634 = vmatprep.subr.mxu1 %v1892_v11 }
  0x39   :  { %1608 = vmatpush3.msra.mxu0 %v2007_v53  ;;  %1635 = vmatpush3.msra.mxu1 %v1892_v11 }
  0x3a   :  { %1609 = vmatprep.subr.mxu0 %v2027_v60  ;;  %1636 = vmatprep.subr.mxu1 %v1907_v16 }
  0x3b   :  { %1610 = vmatpush3.msra.mxu0 %v2027_v60  ;;  %1637 = vmatpush3.msra.mxu1 %v1907_v16 }
  0x3c   :  { %1611 = vmatprep.subr.mxu0 %v2046_v6  ;;  %1638 = vmatprep.subr.mxu1 %v1932_v24 }
  0x3d   :  { %1612 = vmatpush3.msra.mxu0 %v2046_v6  ;;  %1639 = vmatpush3.msra.mxu1 %v1932_v24 }
  0x3e   :  { %1613 = vmatprep.subr.mxu0 %v2065_v30  ;;  %1640 = vmatprep.subr.mxu1 %v1941_v27 }
  0x3f   :  { %1614 = vmatpush3.msra.mxu0 %v2065_v30  ;;  %1641 = vmatpush3.msra.mxu1 %v1941_v27 }
  0x40   :  { %1615 = vmatprep.subr.mxu0 %v2084_v40  ;;  %1642 = vmatprep.subr.mxu1 %v1960_v34 }
  0x41   :  { %1616 = vmatpush3.msra.mxu0 %v2084_v40  ;;  %1643 = vmatpush3.msra.mxu1 %v1960_v34 }
  0x42   :  { %1617 = vmatprep.subr.mxu0 %v2096_v55  ;;  %1644 = vmatprep.subr.mxu1 %v1984_v45 }
  0x43   :  { %1618 = vmatpush3.msra.mxu0 %v2096_v55  ;;  %1645 = vmatpush3.msra.mxu1 %v1984_v45 }
  0x44   :  { %1619 = vmatprep.subr.mxu0 %v2106_v0  ;;  %1646 = vmatprep.subr.mxu1 %v1990_v47 }
  0x45   :  { %1620 = vmatpush3.msra.mxu0 %v2106_v0  ;;  %1621 = vmatprep.mubr.f32.mxu0 %v2062_v25  ;;  %v752_v25 = vlaneseq }
  0x46   :  { %1647 = vmatpush3.msra.mxu1 %v1990_v47  ;;  %1622 = vmatmul.mubr.f32.vlgmr.msra.gmra.mxu0 %v2072_v32 }
  0x47   :  { %1648 = vmatprep.subr.mxu1 %v2018_v57  ;;  %1659 = vmatprep.subr.mxu0 %v1924_v21  ;;  %v2292_v30 = vand.u32 127, %v752_v25 }
  0x48   :  { %1649 = vmatpush3.msra.mxu1 %v2018_v57  ;;  %1660 = vmatpush3.msra.mxu0 %v1924_v21 }
  0x49   :  { %1650 = vmatprep.subr.mxu1 %v2049_v8  ;;  %1661 = vmatprep.subr.mxu0 %v1927_v22 }
  0x4a   :  { %1651 = vmatpush3.msra.mxu1 %v2049_v8  ;;  %1662 = vmatpush3.msra.mxu0 %v1927_v22 }
  0x4b   :  { %1652 = vmatprep.subr.mxu1 %v2068_v31  ;;  %1663 = vmatprep.subr.mxu0 %v1930_v23 }
  0x4c   :  { %1653 = vmatpush3.msra.mxu1 %v2068_v31  ;;  %1664 = vmatpush3.msra.mxu0 %v1930_v23 }
  0x4d   :  { %1654 = vmatprep.subr.mxu1 %v2081_v38  ;;  %1665 = vmatprep.subr.mxu0 %v1939_v26 }
  0x4e   :  { %1655 = vmatpush3.msra.mxu1 %v2081_v38  ;;  %1656 = vmatprep.mubr.f32.mxu1 %v2518_v14 }
  0x4f   :  { %1666 = vmatpush3.msra.mxu0 %v1939_v26  ;;  %1657 = vmatmul.mubr.f32.vlgmr.msra.gmra.mxu1 %v2519_v15 }
  0x50   :  { %1667 = vmatprep.subr.mxu0 %v1944_v28  ;;  %1694 = vmatprep.subr.mxu1 %v1873_v3 }
  0x51   :  { %1668 = vmatpush3.msra.mxu0 %v1944_v28  ;;  %1695 = vmatpush3.msra.mxu1 %v1873_v3 }
  0x52   :  { %1669 = vmatprep.subr.mxu0 %v1969_v39  ;;  %1696 = vmatprep.subr.mxu1 %v1875_v4 }
  0x53   :  { %1670 = vmatpush3.msra.mxu0 %v1969_v39  ;;  %1697 = vmatpush3.msra.mxu1 %v1875_v4  ;;  %v1362_v4 = vld [vmem:[%s2507_s2] ss:$0 sm:$0xff] }
  0x54   :  { %1671 = vmatprep.subr.mxu0 %v1978_v42  ;;  %1698 = vmatprep.subr.mxu1 %v1877_v5 }
  0x55   :  { %1672 = vmatpush3.msra.mxu0 %v1978_v42  ;;  %1699 = vmatpush3.msra.mxu1 %v1877_v5 }
  0x56   :  { %1673 = vmatprep.subr.mxu0 %v2004_v52  ;;  %1700 = vmatprep.subr.mxu1 %v1888_v9 }
  0x57   :  { %1674 = vmatpush3.msra.mxu0 %v2004_v52  ;;  %1701 = vmatpush3.msra.mxu1 %v1888_v9 }
  0x58   :  { %1675 = vmatprep.subr.mxu0 %v2021_v58  ;;  %1702 = vmatprep.subr.mxu1 %v1890_v10 }
  0x59   :  { %1676 = vmatpush3.msra.mxu0 %v2021_v58  ;;  %1703 = vmatpush3.msra.mxu1 %v1890_v10 }
  0x5a   :  { %1677 = vmatprep.subr.mxu0 %v2040_v1  ;;  %1704 = vmatprep.subr.mxu1 %v1892_v11 }
  0x5b   :  { %1678 = vmatpush3.msra.mxu0 %v2040_v1  ;;  %1705 = vmatpush3.msra.mxu1 %v1892_v11 }
  0x5c   :  { %1679 = vmatprep.subr.mxu0 %v2055_v13  ;;  %1706 = vmatprep.subr.mxu1 %v1907_v16 }
  0x5d   :  { %1680 = vmatpush3.msra.mxu0 %v2055_v13  ;;  %1707 = vmatpush3.msra.mxu1 %v1907_v16 }
  0x5e   :  { %1681 = vmatprep.subr.mxu0 %v2078_v37  ;;  %1708 = vmatprep.subr.mxu1 %v1932_v24 }
  0x5f   :  { %1682 = vmatpush3.msra.mxu0 %v2078_v37  ;;  %1709 = vmatpush3.msra.mxu1 %v1932_v24 }
  0x60   :  { %1683 = vmatprep.subr.mxu0 %v2091_v50  ;;  %1710 = vmatprep.subr.mxu1 %v1941_v27 }
  0x61   :  { %1684 = vmatpush3.msra.mxu0 %v2091_v50  ;;  %1711 = vmatpush3.msra.mxu1 %v1941_v27 }
  0x62   :  { %1685 = vmatprep.subr.mxu0 %v2103_v63  ;;  %1712 = vmatprep.subr.mxu1 %v1960_v34 }
  0x63   :  { %1686 = vmatpush3.msra.mxu0 %v2103_v63  ;;  %1713 = vmatpush3.msra.mxu1 %v1960_v34 }
  0x64   :  { %1687 = vmatprep.subr.mxu0 %v2119_v18  ;;  %1714 = vmatprep.subr.mxu1 %v1984_v45 }
  0x65   :  { %1688 = vmatpush3.msra.mxu0 %v2119_v18  ;;  %1715 = vmatpush3.msra.mxu1 %v1984_v45 }
  0x66   :  { %1689 = vmatprep.subr.mxu0 %v2126_v48  ;;  %1716 = vmatprep.subr.mxu1 %v1990_v47 }
  0x67   :  { %1690 = vmatpush3.msra.mxu0 %v2126_v48  ;;  %1691 = vmatprep.mubr.f32.mxu0 %v2030_v61 }
  0x68   :  { %1717 = vmatpush3.msra.mxu1 %v1990_v47  ;;  %1692 = vmatmul.mubr.f32.vlgmr.msra.gmra.mxu0 %v2034_v62 }
  0x69   :  { %1718 = vmatprep.subr.mxu1 %v2018_v57  ;;  %1726 = vmatprep.mubr.f32.mxu1 %v2030_v61 }
  0x6a   :  { %1719 = vmatpush3.msra.mxu1 %v2018_v57 }
  0x6b   :  { %1720 = vmatprep.subr.mxu1 %v2049_v8 }
  0x6c   :  { %1721 = vmatpush3.msra.mxu1 %v2049_v8 }
  0x6d   :  { %1722 = vmatprep.subr.mxu1 %v2068_v31 }
  0x6e   :  { %1723 = vmatpush3.msra.mxu1 %v2068_v31 }
  0x6f   :  { %1724 = vmatprep.subr.mxu1 %v2081_v38 }
  0x70   :  { %1725 = vmatpush3.msra.mxu1 %v2081_v38 }
  0x71   :  { %1727 = vmatmul.mubr.f32.vlgmr.msra.gmra.mxu1 %v2034_v62 }
  0xe5   :  { %v1553_v3 = vpop.f32.mrf.mxu0 }
  0xe6   :  { %v146_v11 = vadd.f32 %v1553_v3, %v1362_v4 }
  0xe7   :  { %v135_v5 = vpop.f32.mrf.mxu0 }
  0xe8   :  { %v136_v17 = vadd.f32 %v1362_v4, %v135_v5 }
  0xed   :  { %v1588_v9 = vpop.f32.mrf.mxu1 }
  0xee   :  { %v303_v21 = vadd.f32 %v1588_v9, %v146_v11 }
  0xef   :  { %v296_v16 = vpop.f32.mrf.mxu1 }
  0xf0   :  { %v297_v23 = vadd.f32 %v296_v16, %v136_v17 }
 0x106   :  { %v1623_v10 = vpop.f32.mrf.mxu0 }
 0x107   :  { %v414_v24 = vadd.f32 %v1623_v10, %v303_v21 }
 0x108   :  { %v406_v19 = vpop.f32.mrf.mxu0 }
 0x109   :  { %v407_v27 = vadd.f32 %v406_v19, %v297_v23 }
 0x10f   :  { %v1658_v20 = vpop.f32.mrf.mxu1 }
 0x110   :  { %v511_v28 = vadd.f32 %v1658_v20, %v414_v24 }
 0x111   :  { %v502_v26 = vpop.f32.mrf.mxu1 }
 0x112   :  { %v503_v33 = vadd.f32 %v502_v26, %v407_v27 }
 0x128   :  { %v1693_v22 = vpop.f32.mrf.mxu0 }
 0x129   :  { %v636_v34 = vadd.f32 %v1693_v22, %v511_v28 }
 0x12a   :  { %v629_v29 = vpop.f32.mrf.mxu0 }
 0x12b   :  { %v630_v42 = vadd.f32 %v629_v29, %v503_v33 }
 0x131   :  { %v1728_v39 = vpop.f32.mrf.mxu1 }
 0x132   :  { %v729_v43 = vadd.f32 %v1728_v39, %v636_v34 }
 0x133   :  { %v722_v45 = vpop.f32.mrf.mxu1 }
 0x134   :  { %733 = vst [vmem:[%s2508_s6 + $0x8] sm:$0xff] %v729_v43  ;;  %v723_v46 = vadd.f32 %v722_v45, %v630_v42  ;;  %v1741_v42 = vld [vmem:[%s2509_s3 + $0x150] ss:$24 sps:$4 sm:$0xff]   ;;  %v1743_v45 = vld [vmem:[%s2509_s3 + $0x154] ss:$24 sps:$4 sm:$0xff]  }
 0x135   :  { %1169 = vmatprep.subr.bf16.mxu0 %v1743_v45 }
 0x136   :  { %732 = vst [vmem:[%s2508_s6] sm:$0xff] %v723_v46  ;;  %734 = vmax.xlane.f32.xlu0 %v723_v46  ;;  %1170 = vmatpush1.bf16.msra.mxu0 %v1741_v42 }
 0x13a   :  { %736 = vmax.xlane.f32.xlu0 %v729_v43 }
 0x1bf   :  { %v735_v47 = vpop.xlane.xlu0 %734 }
 0x1c0   :  { %v738_v49 = vsub.f32 %v723_v46, %v735_v47  ;;  %v1746_v46 = vld [vmem:[%s2509_s3 + $0x124] ss:$24 sps:$4 sm:$0xff]   ;;  %v1744_v47 = vld [vmem:[%s2509_s3 + $0x120] ss:$24 sps:$4 sm:$0xff]  }
 0x1c1   :  { %1171 = vmatprep.subr.bf16.mxu0 %v1746_v46 }
 0x1c2   :  { %v740_v52 = vmul.f32 1.442695, %v738_v49  ;;  %v1749_v49 = vld [vmem:[%s2509_s3 + $0xf4] ss:$24 sps:$4 sm:$0xff]   ;;  %1172 = vmatpush1.bf16.msra.mxu0 %v1744_v47 }
 0x1c3   :  { %v737_v53 = vpop.xlane.xlu0 %736  ;;  %1173 = vmatprep.subr.bf16.mxu0 %v1749_v49 }
 0x1c4   :  { %1813 = vpow2.f32 %v740_v52  ;;  %v739_v54 = vsub.f32 %v729_v43, %v737_v53  ;;  %v1825_v43 = vmov 0   ;;  %v1753_v52 = vld [vmem:[%s2509_s3 + $0x158] ss:$24 sps:$4 sm:$0xff]   ;;  %v1755_v53 = vld [vmem:[%s2509_s3 + $0x15c] ss:$24 sps:$4 sm:$0xff]  }
 0x1c5   :  { %1201 = vmatprep.mubr.bf16.mxu0 %v1825_v43  ;;  %1244 = vmatprep.mubr.bf16.mxu1 %v1825_v43 }
 0x1c6   :  { %v742_v57 = vmul.f32 1.442695, %v739_v54  ;;  %1733 = vset.pattern.permute.xlu0 %v1825_v43  ;;  %1734 = vset.pattern.permute.xlu1 %v1825_v43  ;;  %v1747_v54 = vld [vmem:[%s2509_s3 + $0xf0] ss:$24 sps:$4 sm:$0xff]  }
 0x1c7   :  { %1212 = vmatprep.subr.bf16.mxu1 %v1755_v53  ;;  %1174 = vmatpush1.bf16.msra.mxu0 %v1747_v54 }
 0x1c8   :  { %1815 = vpow2.f32 %v742_v57  ;;  %v1752_v57 = vld [vmem:[%s2509_s3 + $0xc4] ss:$24 sps:$4 sm:$0xff]   ;;  %1213 = vmatpush1.bf16.msra.mxu1 %v1753_v52 }
 0x1c9   :  { %1175 = vmatprep.subr.bf16.mxu0 %v1752_v57 }
 0x1d1   :  { %v1814_v58 = vpop.eup %1813 }
 0x1d2   :  { %744 = vadd.xlane.f32.xlu1 %v1814_v58 }
 0x1d5   :  { %v1816_v60 = vpop.eup %1815 }
 0x1d6   :  { %746 = vadd.xlane.f32.xlu1 %v1816_v60 }
 0x25b   :  { %v745_v61 = vpop.xlane.xlu1 %744 }
 0x25c   :  { %1817 = vrcp.f32 %v745_v61  ;;  %v1750_v61 = vld [vmem:[%s2509_s3 + $0xc0] ss:$24 sps:$4 sm:$0xff]  }
 0x25d   :  { %1176 = vmatpush1.bf16.msra.mxu0 %v1750_v61 }
 0x25f   :  { %v747_v62 = vpop.xlane.xlu1 %746 }
 0x260   :  { %1819 = vrcp.f32 %v747_v62  ;;  %v1767_v62 = vld [vmem:[%s2509_s3 + $0xfc] ss:$24 sps:$4 sm:$0xff]  }
 0x269   :  { %v1818_v1 = vpop.eup %1817 }
 0x26a   :  { %v2285_v6 = vmul.f32 %v1818_v1, %v1814_v58  ;;  %v1759_v58 = vld [vmem:[%s2509_s3 + $0x128] ss:$24 sps:$4 sm:$0xff]   ;;  %v1758_v1 = vld [vmem:[%s2509_s3 + $0x94] ss:$24 sps:$4 sm:$0xff]  }
 0x26b   :  { %1177 = vmatprep.subr.bf16.mxu0 %v1758_v1 }
 0x26c   :  { %754 = vmax.xlane.f32.xlu0 %v2285_v6 }
 0x26d   :  { %v1820_v8 = vpop.eup %1819 }
 0x26e   :  { %v2288_v13 = vmul.f32 %v1820_v8, %v1816_v60  ;;  %v1761_v60 = vld [vmem:[%s2509_s3 + $0x12c] ss:$24 sps:$4 sm:$0xff]   ;;  %v1765_v8 = vld [vmem:[%s2509_s3 + $0xf8] ss:$24 sps:$4 sm:$0xff]  }
 0x26f   :  { %1214 = vmatprep.subr.bf16.mxu1 %v1761_v60 }
 0x270   :  { %756 = vmax.xlane.f32.xlu1 %v2288_v13  ;;  %1215 = vmatpush1.bf16.msra.mxu1 %v1759_v58 }
 0x271   :  { %1216 = vmatprep.subr.bf16.mxu1 %v1767_v62 }
 0x274   :  { %1217 = vmatpush1.bf16.msra.mxu1 %v1765_v8  ;;  %v1826_v8 = vmov 3  }
 0x2f5   :  { %v755_v31 = vpop.xlane.xlu0 %754 }
 0x2f6   :  { %vm758_vm0 = vcmp.eq.f32.partialorder %v2285_v6, %v755_v31  ;;  %v1773_v31 = vld [vmem:[%s2509_s3 + $0xcc] ss:$24 sps:$4 sm:$0xff]  }
 0x2f7   :  { %v760_v32 = vsel %vm758_vm0, %v2292_v30, 128  ;;  %1218 = vmatprep.subr.bf16.mxu1 %v1773_v31  ;;  %v1827_v31 = vmov 1  }
 0x2f8   :  { %v763_v37 = vshra.s32 %v760_v32, 16  ;;  %v762_v55 = vand.u32 65535, %v760_v32  ;;  %v1756_v32 = vld [vmem:[%s2509_s3 + $0x90] ss:$24 sps:$4 sm:$0xff]  }
 0x2f9   :  { %v757_v38 = vpop.xlane.xlu1 %756  ;;  %1178 = vmatpush1.bf16.msra.mxu0 %v1756_v32  ;;  %v900_v32 = vshrl.u32 %v752_v25, 7 }
 0x2fa   :  { %vm759_vm1 = vcmp.eq.f32.partialorder %v2288_v13, %v757_v38  ;;  %v765_v40 = vcvt.s32.f32 %v763_v37  ;;  %v764_v12 = vcvt.s32.f32 %v762_v55  ;;  %v1764_v37 = vld [vmem:[%s2509_s3 + $0x64] ss:$24 sps:$4 sm:$0xff]   ;;  %v1771_v38 = vld [vmem:[%s2509_s3 + $0xc8] ss:$24 sps:$4 sm:$0xff]  }
 0x2fb   :  { %v761_v48 = vsel %vm759_vm1, %v2292_v30, 128  ;;  %1179 = vmatprep.subr.bf16.mxu0 %v1764_v37  ;;  %1219 = vmatpush1.bf16.msra.mxu1 %v1771_v38  ;;  %v1785_v55 = vld [vmem:[%s2509_s3 + $0x6c] ss:$24 sps:$4 sm:$0xff]   ;;  %v901_v38 = vsub.s32 0, %v900_v32 }
 0x2fc   :  { %766 = vmin.xlane.f32.xlu0 %v765_v40  ;;  %v777_v50 = vshra.s32 %v761_v48, 16  ;;  %v776_v63 = vand.u32 65535, %v761_v48  ;;  %v1762_v48 = vld [vmem:[%s2509_s3 + $0x60] ss:$24 sps:$4 sm:$0xff]  }
 0x2fd   :  { %1180 = vmatpush1.bf16.msra.mxu0 %v1762_v48 }
 0x2fe   :  { %v779_v51 = vcvt.s32.f32 %v777_v50  ;;  %v778_v36 = vcvt.s32.f32 %v776_v63  ;;  %v1770_v50 = vld [vmem:[%s2509_s3 + $0x34] ss:$24 sps:$4 sm:$0xff]   ;;  %v1768_v63 = vld [vmem:[%s2509_s3 + $0x30] ss:$24 sps:$4 sm:$0xff]  }
 0x2ff   :  { %1181 = vmatprep.subr.bf16.mxu0 %v1770_v50 }
 0x300   :  { %780 = vmin.xlane.f32.xlu1 %v779_v51 }
 0x301   :  { %1182 = vmatpush1.bf16.msra.mxu0 %v1768_v63 }
 0x385   :  { %v767_v0 = vpop.xlane.xlu0 %766 }
 0x386   :  { %vm768_vm2 = vcmp.eq.f32.partialorder %v765_v40, %v767_v0  ;;  %v773_v41 = vcvt.f32.s32 %v767_v0  ;;  %v1779_v40 = vld [vmem:[%s2509_s3 + $0x9c] ss:$24 sps:$4 sm:$0xff]  }
 0x387   :  { %v769_v35 = vsel %vm768_vm2, %v764_v12, inf  ;;  %1220 = vmatprep.subr.bf16.mxu1 %v1779_v40  ;;  %v1776_v0 = vld [vmem:[%s2509_s3 + $0x4] ss:$24 sps:$4 sm:$0xff]   ;;  %v1783_v12 = vld [vmem:[%s2509_s3 + $0x68] ss:$24 sps:$4 sm:$0xff]   ;;  %v905_v40 = vsub.s32 1, %v900_v32 }
 0x388   :  { %770 = vmin.xlane.f32.xlu0 %v769_v35  ;;  %v774_v56 = vshll.u32 %v773_v41, 16  ;;  %v1791_v35 = vld [vmem:[%s2509_s3 + $0x3c] ss:$24 sps:$4 sm:$0xff]   ;;  %1183 = vmatprep.subr.bf16.mxu0 %v1776_v0  ;;  %v1797_v41 = vld [vmem:[%s2509_s3 + $0xc] ss:$24 sps:$4 sm:$0xff]  }
 0x389   :  { %v781_v18 = vpop.xlane.xlu1 %780 }
 0x38a   :  { %vm782_vm3 = vcmp.eq.f32.partialorder %v779_v51, %v781_v18  ;;  %v787_v2 = vcvt.f32.s32 %v781_v18  ;;  %v1777_v51 = vld [vmem:[%s2509_s3 + $0x98] ss:$24 sps:$4 sm:$0xff]  }
 0x38b   :  { %v783_v44 = vsel %vm782_vm3, %v778_v36, inf  ;;  %1221 = vmatpush1.bf16.msra.mxu1 %v1777_v51  ;;  %v1774_v18 = vld [vmem:[%s2509_s3] ss:$24 sps:$4 sm:$0xff]   ;;  %v1782_v36 = vld [vmem:[%s2509_s3 + $0x164] ss:$24 sps:$4 sm:$0xff]  }
 0x38c   :  { %784 = vmin.xlane.f32.xlu1 %v783_v44  ;;  %v788_v3 = vshll.u32 %v787_v2, 16  ;;  %1222 = vmatprep.subr.bf16.mxu1 %v1785_v55  ;;  %v1789_v44 = vld [vmem:[%s2509_s3 + $0x38] ss:$24 sps:$4 sm:$0xff]   ;;  %v897_v51 = vld [vmem:[%s2510_s4] sm:$0x3f]  ;;  %v909_v55 = vsub.s32 2, %v900_v32 }
 0x38d   :  { %1184 = vmatpush1.bf16.msra.mxu0 %v1774_v18  ;;  %v902_v0 = vrot.slane %v897_v51, %v901_v38 }
 0x38e   :  { %1255 = vmatprep.subr.bf16.mxu0 %v1782_v36  ;;  %v910_v36 = vrot.slane %v897_v51, %v909_v55 }
 0x38f   :  { %1223 = vmatpush1.bf16.msra.mxu1 %v1783_v12  ;;  %v906_v12 = vrot.slane %v897_v51, %v905_v40 }
 0x390   :  { %1224 = vmatprep.subr.bf16.mxu1 %v1791_v35 }
 0x393   :  { %1225 = vmatpush1.bf16.msra.mxu1 %v1789_v44  ;;  %v913_v44 = vsub.s32 3, %v900_v32 }
 0x394   :  { %1226 = vmatprep.subr.bf16.mxu1 %v1797_v41 }
 0x411   :  { %v771_v59 = vpop.xlane.xlu0 %770 }
 0x412   :  { %v772_v7 = vcvt.f32.s32 %v771_v59  ;;  %v2520_v59 = vld [vmem:[#allocation2_spill] sm:$0xff] }
 0x414   :  { %v2298_v14 = vadd.s32 %v774_v56, %v772_v7  ;;  %v2521_v56 = vld [vmem:[#allocation3_spill] sm:$0xff]  ;;  %v1780_v7 = vld [vmem:[%s2509_s3 + $0x160] ss:$24 sps:$4 sm:$0xff]  }
 0x415   :  { %v785_v15 = vpop.xlane.xlu1 %784  ;;  %v848_v2 = vpack.c.bf16 %v2521_v56, %v2520_v59  ;;  %v917_v59 = vsub.s32 4, %v900_v32 }
 0x416   :  { %v786_v4 = vcvt.f32.s32 %v785_v15  ;;  %vm790_vm4 = vcmp.eq.s32.totalorder %v2292_v30, %v2298_v14  ;;  %v1788_v15 = vld [vmem:[%s2509_s3 + $0x134] ss:$24 sps:$4 sm:$0xff]  }
 0x417   :  { %v2306_v5 = vsel %vm790_vm4, -inf, %v2285_v6  ;;  %1202 = vmatmul.mubr.bf16.vlgmr.msra.gmra.mxu0 %v848_v2  ;;  %v792_v53 = vsel %vm790_vm4, %v2285_v6, 0.0 }
 0x418   :  { %v2308_v9 = vadd.s32 %v788_v3, %v786_v4  ;;  %798 = vmax.xlane.f32.xlu0 %v2306_v5  ;;  %v1795_v3 = vld [vmem:[%s2509_s3 + $0x8] ss:$24 sps:$4 sm:$0xff]   ;;  %1256 = vmatpush1.bf16.msra.mxu0 %v1780_v7 }
 0x419   :  { %v1786_v4 = vld [vmem:[%s2509_s3 + $0x130] ss:$24 sps:$4 sm:$0xff]   ;;  %1287 = vmatprep.mubr.bf16.mxu0 %v1825_v43  ;;  %1257 = vmatprep.subr.bf16.mxu0 %v1788_v15 }
 0x41a   :  { %vm791_vm5 = vcmp.eq.s32.totalorder %v2292_v30, %v2308_v9  ;;  %1227 = vmatpush1.bf16.msra.mxu1 %v1795_v3 }
 0x41b   :  { %v2317_v10 = vsel %vm791_vm5, -inf, %v2288_v13 }
 0x41c   :  { %800 = vmax.xlane.f32.xlu1 %v2317_v10  ;;  %1258 = vmatpush1.bf16.msra.mxu0 %v1786_v4  ;;  %v914_v4 = vrot.slane %v897_v51, %v913_v44 }
 0x41d   :  { %1245 = vmatmul.mubr.bf16.vlgmr.msra.gmra.mxu1 %v848_v2 }
 0x4a1   :  { %v799_v11 = vpop.xlane.xlu0 %798 }
 0x4a2   :  { %vm802_vm6 = vcmp.eq.f32.partialorder %v2306_v5, %v799_v11  ;;  %v1794_v11 = vld [vmem:[%s2509_s3 + $0x104] ss:$24 sps:$4 sm:$0xff]  }
 0x4a3   :  { %v804_v16 = vsel %vm802_vm6, %v2292_v30, 128  ;;  %1259 = vmatprep.subr.bf16.mxu0 %v1794_v11 }
 0x4a4   :  { %v807_v17 = vshra.s32 %v804_v16, 16  ;;  %v806_v24 = vand.u32 65535, %v804_v16  ;;  %v1792_v16 = vld [vmem:[%s2509_s3 + $0x100] ss:$24 sps:$4 sm:$0xff]  }
 0x4a5   :  { %v801_v19 = vpop.xlane.xlu1 %800  ;;  %1260 = vmatpush1.bf16.msra.mxu0 %v1792_v16 }
 0x4a6   :  { %vm803_vm7 = vcmp.eq.f32.partialorder %v2317_v10, %v801_v19  ;;  %v809_v20 = vcvt.s32.f32 %v807_v17  ;;  %v808_v28 = vcvt.s32.f32 %v806_v24  ;;  %v1800_v17 = vld [vmem:[%s2509_s3 + $0xd4] ss:$24 sps:$4 sm:$0xff]   ;;  %v1798_v19 = vld [vmem:[%s2509_s3 + $0xd0] ss:$24 sps:$4 sm:$0xff]   ;;  %v1809_v24 = vld [vmem:[%s2509_s3 + $0x44] ss:$24 sps:$4 sm:$0xff]  }
 0x4a7   :  { %v805_v21 = vsel %vm803_vm7, %v2292_v30, 128  ;;  %1261 = vmatprep.subr.bf16.mxu0 %v1800_v17  ;;  %v918_v17 = vrot.slane %v897_v51, %v917_v59 }
 0x4a8   :  { %810 = vmin.xlane.f32.xlu0 %v809_v20  ;;  %v821_v22 = vshra.s32 %v805_v21, 16  ;;  %v820_v26 = vand.u32 65535, %v805_v21  ;;  %v1801_v21 = vld [vmem:[%s2509_s3 + $0xa0] ss:$24 sps:$4 sm:$0xff]  }
 0x4a9   :  { %1262 = vmatpush1.bf16.msra.mxu0 %v1798_v19  ;;  %v921_v19 = vsub.s32 5, %v900_v32 }
 0x4aa   :  { %v823_v23 = vcvt.s32.f32 %v821_v22  ;;  %v822_v34 = vcvt.s32.f32 %v820_v26  ;;  %v1806_v22 = vld [vmem:[%s2509_s3 + $0x74] ss:$24 sps:$4 sm:$0xff]   ;;  %v1807_v26 = vld [vmem:[%s2509_s3 + $0x40] ss:$24 sps:$4 sm:$0xff]  }
 0x4ac   :  { %824 = vmin.xlane.f32.xlu1 %v823_v23 }
 0x4d7   :  { %v1203_v9 = vpop.f32.mrf.mxu0 }
 0x4d8   :  { %v1204_v25 = vadd.f32 %v1203_v9, %v902_v0 }
 0x4d9   :  { %v1205_v37 = vpop.f32.mrf.mxu0 }
 0x4da   :  { %v1206_v56 = vadd.f32 %v1205_v37, %v906_v12 }
 0x4db   :  { %v1207_v63 = vpop.f32.mrf.mxu0 }
 0x4dd   :  { %v1246_v48 = vpop.f32.mrf.mxu1  ;;  %v1209_v41 = vpop.f32.mrf.mxu0 }
 0x4df   :  { %v1248_v35 = vpop.f32.mrf.mxu1 }
 0x4e1   :  { %v1250_v7 = vpop.f32.mrf.mxu1 }
 0x531   :  { %v2324_v27 = vpop.xlane.xlu0 %810 }
 0x532   :  { %vm812_vm8 = vcmp.eq.f32.partialorder %v809_v20, %v2324_v27  ;;  %v1803_v20 = vld [vmem:[%s2509_s3 + $0xa4] ss:$24 sps:$4 sm:$0xff]  }
 0x533   :  { %v813_v29 = vsel %vm812_vm8, %v808_v28, inf  ;;  %1263 = vmatprep.subr.bf16.mxu0 %v1803_v20  ;;  %v1812_v28 = vld [vmem:[%s2509_s3 + $0x14] ss:$24 sps:$4 sm:$0xff]   ;;  %v1210_v20 = vadd.f32 %v1209_v41, %v906_v12 }
 0x534   :  { %814 = vmin.xlane.f32.xlu0 %v813_v29  ;;  %1264 = vmatpush1.bf16.msra.mxu0 %v1801_v21  ;;  %v1810_v29 = vld [vmem:[%s2509_s3 + $0x10] ss:$24 sps:$4 sm:$0xff]  }
 0x535   :  { %v2327_v33 = vpop.xlane.xlu1 %824  ;;  %1265 = vmatprep.subr.bf16.mxu0 %v1806_v22  ;;  %v1251_v22 = vadd.f32 %v1250_v7, %v910_v36 }
 0x536   :  { %vm826_vm9 = vcmp.eq.f32.partialorder %v823_v23, %v2327_v33  ;;  %v1804_v23 = vld [vmem:[%s2509_s3 + $0x70] ss:$24 sps:$4 sm:$0xff]   ;;  %v831_v43 = vcvt.f32.s32 %v2327_v33  ;;  %v793_v33 = vsel %vm791_vm5, %v2288_v13, 0.0  ;;  %v1828_v13 = vmov 2  }
 0x537   :  { %v827_v39 = vsel %vm826_vm9, %v822_v34, inf  ;;  %v817_v34 = vcvt.f32.s32 %v2324_v27 }
 0x538   :  { %828 = vmin.xlane.f32.xlu1 %v827_v39  ;;  %1266 = vmatpush1.bf16.msra.mxu0 %v1804_v23  ;;  %v832_v49 = vshll.u32 %v831_v43, 16  ;;  %v922_v43 = vrot.slane %v897_v51, %v921_v19 }
 0x539   :  { %1267 = vmatprep.subr.bf16.mxu0 %v1809_v24  ;;  %v818_v42 = vshll.u32 %v817_v34, 16 }
 0x53c   :  { %1268 = vmatpush1.bf16.msra.mxu0 %v1807_v26  ;;  %v1208_v26 = vadd.f32 %v1207_v63, %v902_v0 }
 0x53d   :  { %1269 = vmatprep.subr.bf16.mxu0 %v1812_v28 }
 0x540   :  { %1270 = vmatpush1.bf16.msra.mxu0 %v1810_v29  ;;  %v1249_v29 = vadd.f32 %v1248_v35, %v914_v4 }
 0x543   :  { %1288 = vmatmul.mubr.bf16.vlgmr.msra.gmra.mxu0 %v848_v2  ;;  %v1247_v2 = vadd.f32 %v1246_v48, %v910_v36 }
 0x5bd   :  { %v815_v39 = vpop.xlane.xlu0 %814 }
 0x5be   :  { %v816_v45 = vcvt.f32.s32 %v815_v39  ;;  %v1252_v39 = vpop.f32.mrf.mxu1 }
 0x5c0   :  { %v819_v46 = vadd.s32 %v818_v42, %v816_v45 }
 0x5c1   :  { %v829_v47 = vpop.xlane.xlu1 %828 }
 0x5c2   :  { %v830_v52 = vcvt.f32.s32 %v829_v47  ;;  %vm834_vm10 = vcmp.eq.s32.totalorder %v2292_v30, %v819_v46 }
 0x5c3   :  { %v836_v54 = vsel %vm834_vm10, %v2306_v5, 0.0 }
 0x5c4   :  { %v833_v57 = vadd.s32 %v832_v49, %v830_v52  ;;  %v838_v27 = vadd.f32 %v836_v54, %v792_v53 }
 0x5c6   :  { %840 = vadd.xlane.f32.xlu0 %v838_v27  ;;  %vm835_vm11 = vcmp.eq.s32.totalorder %v2292_v30, %v833_v57  ;;  %v1253_v57 = vadd.f32 %v1252_v39, %v914_v4 }
 0x5c7   :  { %v837_v58 = vsel %vm835_vm11, %v2317_v10, 0.0 }
 0x5c8   :  { %v839_v60 = vadd.f32 %v837_v58, %v793_v33 }
 0x5ca   :  { %842 = vadd.xlane.f32.xlu1 %v839_v60 }
 0x603   :  { %v1289_v3 = vpop.f32.mrf.mxu0 }
 0x604   :  { %v1290_v42 = vadd.f32 %v1289_v3, %v918_v17 }
 0x605   :  { %v1291_v24 = vpop.f32.mrf.mxu0 }
 0x607   :  { %v1293_v53 = vpop.f32.mrf.mxu0 }
 0x64f   :  { %v841_v61 = vpop.xlane.xlu0 %840 }
 0x650   :  { %1821 = vrcp.f32 %v841_v61 }
 0x653   :  { %v843_v14 = vpop.xlane.xlu1 %842 }
 0x654   :  { %1823 = vrcp.f32 %v843_v14 }
 0x65d   :  { %v1822_v6 = vpop.eup %1821 }
 0x65e   :  { %v846_v5 = vmul.f32 %v1822_v6, %v838_v27  ;;  %v1295_v6 = vpop.f32.mrf.mxu0 }
 0x660   :  { %1300 = vperm.xlu0 %1733, %v846_v5  }
 0x661   :  { %v1824_v62 = vpop.eup %1823 }
 0x662   :  { %v847_v1 = vmul.f32 %v1824_v62, %v839_v60  ;;  %v1292_v60 = vadd.f32 %v1291_v24, %v922_v43 }
 0x664   :  { %1305 = vperm.xlu1 %1734, %v847_v1   ;;  %1740 = vset.pattern.permute.xlu0 %v1826_v8 }
 0x668   :  { %1735 = vset.pattern.permute.xlu1 %v1827_v31 }
 0x669   :  { %1317 = vperm.xlu1 %1735, %v847_v1  }
 0x66d   :  { %1736 = vset.pattern.permute.xlu1 %v1828_v13 }
 0x66e   :  { %1329 = vperm.xlu1 %1736, %v847_v1  }
 0x672   :  { %1737 = vset.pattern.permute.xlu1 %v1827_v31 }
 0x673   :  { %1313 = vperm.xlu1 %1737, %v846_v5  }
 0x677   :  { %1738 = vset.pattern.permute.xlu1 %v1828_v13 }
 0x678   :  { %1325 = vperm.xlu1 %1738, %v846_v5  }
 0x67c   :  { %1739 = vset.pattern.permute.xlu1 %v1826_v8  ;;  %v1296_v8 = vadd.f32 %v1295_v6, %v922_v43 }
 0x67d   :  { %1337 = vperm.xlu1 %1739, %v846_v5   ;;  %v1294_v5 = vadd.f32 %v1293_v53, %v918_v17 }
 0x681   :  { %1341 = vperm.xlu1 %1739, %v847_v1  }
 0x6db   :  { %v1301_v15 = vpop.permute.xlu0 %1300 }
 0x6dc   :  { %v1308_v21 = vmul.f32 %v1301_v15, %v1204_v25 }
 0x6df   :  { %v1306_v30 = vpop.permute.xlu1 %1305 }
 0x6e0   :  { %v1309_v46 = vmul.f32 %v1306_v30, %v1208_v26 }
 0x6e4   :  { %v1318_v10 = vpop.permute.xlu1 %1317 }
 0x6e5   :  { %v1321_v28 = vmul.f32 %v1318_v10, %v1210_v20 }
 0x6e7   :  { %v1323_v54 = vadd.f32 %v1321_v28, %v1309_v46 }
 0x6e9   :  { %v1330_v50 = vpop.permute.xlu1 %1329 }
 0x6ea   :  { %v1333_v47 = vmul.f32 %v1330_v50, %v1251_v22 }
 0x6ec   :  { %v1335_v58 = vadd.f32 %v1333_v47, %v1323_v54 }
 0x6ee   :  { %v1314_v18 = vpop.permute.xlu1 %1313 }
 0x6ef   :  { %v1320_v11 = vmul.f32 %v1314_v18, %v1206_v56 }
 0x6f1   :  { %v1322_v34 = vadd.f32 %v1320_v11, %v1308_v21 }
 0x6f3   :  { %v1326_v16 = vpop.permute.xlu1 %1325 }
 0x6f4   :  { %v1332_v23 = vmul.f32 %v1326_v16, %v1247_v2 }
 0x6f6   :  { %v1334_v49 = vadd.f32 %v1332_v23, %v1322_v34 }
 0x6f8   :  { %v1338_v45 = vpop.permute.xlu1 %1337 }
 0x6f9   :  { %v1344_v52 = vmul.f32 %v1338_v45, %v1249_v29 }
 0x6fb   :  { %v1346_v27 = vadd.f32 %v1344_v52, %v1334_v49 }
 0x6fc   :  { %v1342_v33 = vpop.permute.xlu1 %1341 }
 0x6fd   :  { %v1348_v61 = vadd.f32 %v1346_v27, %v1290_v42  ;;  %v1345_v14 = vmul.f32 %v1342_v33, %v1253_v57 }
 0x6ff   :  { %v1350_v62 = vadd.f32 %v1348_v61, %v1292_v60  ;;  %v1347_v1 = vadd.f32 %v1345_v14, %v1335_v58 }
 0x701   :  { %1352 = vst [vmem:[%s2511_s5] sm:$0xff] %v1350_v62  ;;  %v1349_v31 = vadd.f32 %v1347_v1, %v1294_v5 }
 0x703   :  { %v1351_v13 = vadd.f32 %v1349_v31, %v1296_v8 }
 0x705   :  { %1353 = vst [vmem:[%s2511_s5 + $0x8] sm:$0xff] %v1351_v13 }

</bundles_post_ra>
